<compile_context>
chip_gen: v7x
topology: tpu7x:2x2x1
jax: 0.10.0
libtpu: 0.0.40
codegen_flags: <defaults>
</compile_context>

<pallas_src>
import math

import jax
import jax.numpy as jnp
from jax.experimental import pallas as pl
from jax.experimental.pallas import tpu as pltpu

HID = 32                  # hidden width of every encoder layer (fixed by the module)
HID2 = 2 * HID            # fused actor|critic hidden width
ROW_ALIGN = 16            # slab row alignment (bf16 sublane packing = 16 rows/vreg)
LOG_2PI = math.log(2.0 * math.pi)


def _round_up(x, m):
    return ((x + m - 1) // m) * m


# ----------------------------------------------------------------------------- kernel
def build_actor_critic_kernel(d_pad, act_dim, enc_w, r_w2, r_w3, out_w, mm_dtype):
    """Kernel over one batch tile.

    Inputs:
      x_ref : (TB, d_pad + act_dim) f32   cols [0,d_pad)=obs (zero padded), then action
      w_ref : weight slab (mm_dtype)      rows [0,d_pad)=W1, [r_w2,r_w2+enc_w)=W2,
                                          [r_w3,r_w3+HID2)=W3 (cols [0,out_w))
      v_ref : (8, Cv) f32                 row0=b1, row1=b2, row2=b3, row3=log_std
    Output:
      out_ref : (TB, out_w) f32           cols [0,act_dim)=mean, act_dim=value,
                                          act_dim+1=logp, rest zero.
    """

    def mm(x, w):
        # weights are pre-cast in the slab; only the (cheap) activation cast is in-kernel
        return jnp.dot(x.astype(mm_dtype), w, preferred_element_type=jnp.float32)

    def kernel(x_ref, w_ref, v_ref, out_ref):
        tb = x_ref.shape[0]

        obs = x_ref[:, 0:d_pad]                          # (TB, d_pad)
        action = x_ref[:, d_pad:d_pad + act_dim]         # (TB, act_dim)

        # static, aligned slices of the packed weight slab
        W1 = w_ref[0:d_pad, 0:enc_w]                     # (d_pad, enc_w)
        W2 = w_ref[r_w2:r_w2 + enc_w, 0:HID2]            # (enc_w, 64)
        W3 = w_ref[r_w3:r_w3 + HID2, 0:out_w]            # (64, out_w)
        b1 = v_ref[0:1, 0:enc_w]                         # (1, enc_w)
        b2 = v_ref[1:2, 0:HID2]                          # (1, 64)
        b3 = v_ref[2:3, 0:out_w]                         # (1, out_w)
        log_std = v_ref[3:4, 0:act_dim]                  # (1, act_dim)

        # fused actor+critic encoders: 3 matmuls total
        h1 = jnp.tanh(mm(obs, W1) + b1)                  # (TB, enc_w)
        h2 = jnp.tanh(mm(h1, W2) + b2)                   # (TB, 64): [actor enc | critic enc]
        head = mm(h2, W3) + b3                           # (TB, out_w): [mean | value | 0]

        mean = head[:, 0:act_dim]                        # (TB, act_dim)

        # Normal(mean, std).log_prob(action).sum(-1); inv_var via EUP exp (no divide)
        inv_var = jnp.exp(-2.0 * log_std)                # (1, act_dim)
        logp = jnp.sum(
            -0.5 * (action - mean) ** 2 * inv_var - log_std - 0.5 * LOG_2PI,
            axis=-1, keepdims=True)                      # (TB, 1)

        # blend logp into column act_dim+1 and do ONE dense store
        lane = jax.lax.broadcasted_iota(jnp.int32, (tb, out_w), 1)
        out_ref[...] = jnp.where(lane == act_dim + 1, logp, head)

    return kernel


# ----------------------------------------------------------------------------- param packing
def pack_params(params, obs_dim, act_dim, out_w, w_dtype):
    """Pack fused weights into one slab (w_dtype) + one small f32 vector-param array."""
    n = len(obs_dim)
    d_total = sum(obs_dim)
    enc_w = n * HID2
    d_pad = _round_up(d_total, ROW_ALIGN)
    r_w2 = d_pad
    r_w3 = r_w2 + _round_up(enc_w, ROW_ALIGN)            # enc_w is already a mult of 16
    R = r_w3 + _round_up(HID2, ROW_ALIGN)
    C = max(enc_w, out_w)

    a, c = params["actor"], params["critic"]

    W = jnp.zeros((R, C), jnp.float32)
    # W1: per-obs encoders; actor cols [i*64, i*64+32), critic cols [i*64+32, (i+1)*64)
    off = 0
    for i, d in enumerate(obs_dim):
        W = W.at[off:off + d, i * HID2:i * HID2 + HID].set(a["enc_W"][i])
        W = W.at[off:off + d, i * HID2 + HID:(i + 1) * HID2].set(c["enc_W"][i])
        off += d
    # W2: block-diagonal final encoders -> h2 = [actor enc(32) | critic enc(32)]
    for i in range(n):
        W = W.at[r_w2 + i * HID2:r_w2 + i * HID2 + HID, 0:HID].set(
            a["Wf"][i * HID:(i + 1) * HID, :])
        W = W.at[r_w2 + i * HID2 + HID:r_w2 + (i + 1) * HID2, HID:HID2].set(
            c["Wf"][i * HID:(i + 1) * HID, :])
    # W3: mean head (cols 0:act_dim) + value head (col act_dim); rest zero
    W = W.at[r_w3:r_w3 + HID, 0:act_dim].set(a["Wm"])
    W = W.at[r_w3 + HID:r_w3 + HID2, act_dim:act_dim + 1].set(c["Wc"])
    W = W.astype(w_dtype)

    # vector params stay f32: b1 | b2 | b3 | log_std
    Cv = max(enc_w, HID2, out_w, act_dim)
    V = jnp.zeros((8, Cv), jnp.float32)
    b1 = jnp.zeros((enc_w,), jnp.float32)
    for i in range(n):
        b1 = b1.at[i * HID2:i * HID2 + HID].set(a["enc_b"][i][0])
        b1 = b1.at[i * HID2 + HID:(i + 1) * HID2].set(c["enc_b"][i][0])
    V = V.at[0, 0:enc_w].set(b1)
    V = V.at[1, 0:HID2].set(jnp.concatenate([a["bf"][0], c["bf"][0]], axis=-1))
    V = V.at[2, 0:act_dim].set(a["bm"][0])
    V = V.at[2, act_dim].set(c["bc"][0, 0])
    V = V.at[3, 0:act_dim].set(a["log_std"][0])

    layout = dict(d_pad=d_pad, enc_w=enc_w, r_w2=r_w2, r_w3=r_w3)
    return W, V, layout


# ----------------------------------------------------------------------------- wrapper
def actor_critic_forward(obs_list, action, params, *, use_bf16=False, block_b=1024):
    obs_dim = [int(o.shape[-1]) for o in obs_list]
    B = int(obs_list[0].shape[0])
    act_dim = int(action.shape[-1])
    out_w = max(8, _round_up(act_dim + 2, 8))            # mean | value | logp (+ zero pad)

    mm_dtype = jnp.bfloat16 if use_bf16 else jnp.float32
    Wslab, vparams, L = pack_params(params, obs_dim, act_dim, out_w, mm_dtype)
    d_pad, enc_w = L["d_pad"], L["enc_w"]

    # batch tile: multiple of 8, <= block_b, and no larger than ceil(B/2) rounded to 8
    # so that (when B allows it) the grid has >=2 steps and shards across v7x TensorCores.
    TB = max(8, min(_round_up(block_b, 8), _round_up(-(-B // 2), 8)))
    B_pad = _round_up(B, TB)

    # single fused input slab: [obs (zero-padded to d_pad) | action]
    d_in = d_pad + act_dim
    obs_cat = jnp.concatenate([o.astype(jnp.float32) for o in obs_list], axis=-1)
    x = jnp.zeros((B, d_in), jnp.float32)
    x = x.at[:, 0:sum(obs_dim)].set(obs_cat)
    x = x.at[:, d_pad:d_pad + act_dim].set(action.astype(jnp.float32))
    if B_pad != B:
        x = jnp.pad(x, ((0, B_pad - B), (0, 0)))
    grid = (B_pad // TB,)

    kernel = build_actor_critic_kernel(
        d_pad, act_dim, enc_w, L["r_w2"], L["r_w3"], out_w, mm_dtype)

    out = pl.pallas_call(
        kernel,
        out_shape=jax.ShapeDtypeStruct((B_pad, out_w), jnp.float32),
        grid_spec=pltpu.PrefetchScalarGridSpec(
            num_scalar_prefetch=0,
            grid=grid,
            in_specs=[
                pl.BlockSpec((TB, d_in), lambda i: (i, 0)),       # obs||action rows
                pl.BlockSpec(Wslab.shape, lambda i: (0, 0)),      # weight slab, resident
                pl.BlockSpec(vparams.shape, lambda i: (0, 0)),    # biases/log_std, resident
            ],
            out_specs=pl.BlockSpec((TB, out_w), lambda i: (i, 0)),
        ),
        compiler_params=pltpu.CompilerParams(
            dimension_semantics=("parallel",),
            vmem_limit_bytes=32 << 20),
    )(x, Wslab, vparams)

    mean = out[:B, 0:act_dim]
    value = out[:B, act_dim:act_dim + 1]
    logp = out[:B, act_dim + 1]
    # std / entropy are batch-invariant -> computed in the wrapper (no kernel writeback)
    log_std = params["actor"]["log_std"]                          # (1, act_dim)
    std = jnp.exp(log_std)
    ent = 0.5 + 0.5 * LOG_2PI + jnp.mean(log_std)
    return mean, std, value, logp, ent


# ----------------------------------------------------------------------------- params
def init_linear(key, fan_in, fan_out):
    kw, kb = jax.random.split(key)
    bound = 1.0 / math.sqrt(fan_in)
    W = jax.random.uniform(kw, (fan_in, fan_out), jnp.float32, -bound, bound)
    b = jax.random.uniform(kb, (1, fan_out), jnp.float32, -bound, bound)
    return W, b


def init_params(key, obs_dim, act_dim):
    def init_branch(key, head_out):
        keys = jax.random.split(key, len(obs_dim) + 2)
        enc_W, enc_b = [], []
        for i, d in enumerate(obs_dim):
            W, b = init_linear(keys[i], d, HID)
            enc_W.append(W); enc_b.append(b)
        Wf, bf = init_linear(keys[len(obs_dim)], len(obs_dim) * HID, HID)
        Wh, bh = init_linear(keys[len(obs_dim) + 1], HID, head_out)
        return enc_W, enc_b, Wf, bf, Wh, bh

    ka, kc = jax.random.split(key)
    aW, ab, aWf, abf, aWm, abm = init_branch(ka, act_dim)
    cW, cb, cWf, cbf, cWc, cbc = init_branch(kc, 1)
    return {
        "actor": {
            "enc_W": aW, "enc_b": ab, "Wf": aWf, "bf": abf,
            "Wm": aWm, "bm": abm,
            "log_std": jnp.zeros((1, act_dim), jnp.float32),  # nn.Parameter(torch.zeros(act_dim))
        },
        "critic": {
            "enc_W": cW, "enc_b": cb, "Wf": cWf, "bf": cbf,
            "Wc": cWc, "bc": cbc,
        },
    }


# ----------------------------------------------------------------------------- pure-JAX reference
def reference_forward(obs_list, action, params):
    def encode(p):
        encs = [jnp.tanh(o @ W + b)
                for o, W, b in zip(obs_list, p["enc_W"], p["enc_b"])]
        cat = jnp.concatenate(encs, axis=-1)
        return jnp.tanh(cat @ p["Wf"] + p["bf"])

    ap, cp = params["actor"], params["critic"]
    pe = encode(ap)
    mean = pe @ ap["Wm"] + ap["bm"]
    std = jnp.exp(ap["log_std"])
    ve = encode(cp)
    value = ve @ cp["Wc"] + cp["bc"]
    var = std * std
    logp = jnp.sum(
        -((action - mean) ** 2) / (2.0 * var) - ap["log_std"] - 0.5 * LOG_2PI,
        axis=-1,
    )
    ent = jnp.mean(jnp.broadcast_to(0.5 + 0.5 * LOG_2PI + ap["log_std"], mean.shape))
    return mean, std, value, logp, ent


# ----------------------------------------------------------------------------- main
if __name__ == "__main__":
    obs_dim = [4, 6]   # two observation types
    act_dim = 3
    B = 2
    names = ["mean", "std", "value", "logp", "entropy"]

    key = jax.random.PRNGKey(0)
    kp, k0, k1, ka = jax.random.split(key, 4)
    params = init_params(kp, obs_dim, act_dim)

    obs_list = [
        jax.random.normal(k0, (B, obs_dim[0]), jnp.float32),
        jax.random.normal(k1, (B, obs_dim[1]), jnp.float32),
    ]
    action = jax.random.normal(ka, (B, act_dim), jnp.float32)

    # f32 path, single grid step
    outs = jax.block_until_ready(actor_critic_forward(obs_list, action, params))
    refs = reference_forward(obs_list, action, params)
    for name, a, b in zip(names, outs, refs):
        assert jnp.allclose(a, b, atol=2e-5), f"{name} mismatch"

    # multi-tile batch grid path (exercises row tiling, padding, >=2-step 'parallel' axis)
    B2 = 260
    kb0, kb1, kb2 = jax.random.split(jax.random.PRNGKey(1), 3)
    obs2 = [jax.random.normal(kb0, (B2, obs_dim[0]), jnp.float32),
            jax.random.normal(kb1, (B2, obs_dim[1]), jnp.float32)]
    act2 = jax.random.normal(kb2, (B2, act_dim), jnp.float32)
    outs2 = jax.block_until_ready(actor_critic_forward(obs2, act2, params))
    refs2 = reference_forward(obs2, act2, params)
    for name, a, b in zip(names, outs2, refs2):
        assert jnp.allclose(a, b, atol=2e-5), f"tiled {name} mismatch"

    # bf16 MXU path (v6e/v7x optimization; keep f32 on v5e): tolerance-checked vs f32 path
    outs_bf16 = jax.block_until_ready(
        actor_critic_forward(obs_list, action, params, use_bf16=True))
    tols = {"mean": 0.1, "std": 0.1, "value": 0.1, "logp": 0.5, "entropy": 0.1}
    for name, a, b in zip(names, outs_bf16, outs):
        assert bool(jnp.all(jnp.isfinite(a))), f"bf16 {name} not finite"
        assert jnp.allclose(a, b, atol=tols[name]), f"bf16 {name} drifted from f32 path"

    print("KERNEL_OK")
</pallas_src>

<mosaic_0001>
module attributes {stable_mosaic.version = 11 : i64} {
  func.func @kernel(%arg0: i32, %arg1: memref<8x19xf32, #tpu.memory_space<vmem>>, %arg2: memref<208x128xf32, #tpu.memory_space<vmem>>, %arg3: memref<8x128xf32, #tpu.memory_space<vmem>>, %arg4: memref<8x8xf32, #tpu.memory_space<vmem>>) attributes {dimension_semantics = [#tpu.dimension_semantics<parallel>], iteration_bounds = array<i64: 1>, scalar_prefetch = 0 : i64, scratch_operands = 0 : i64, tpu.core_type = #tpu.core_type<tc>, window_params = [{transform_indices = @transform_0, window_bounds = array<i64: 8, 19>}, {pipeline_mode = #tpu.pipeline_mode<synchronous>, transform_indices = @transform_1, window_bounds = array<i64: 208, 128>}, {pipeline_mode = #tpu.pipeline_mode<synchronous>, transform_indices = @transform_2, window_bounds = array<i64: 8, 128>}, {transform_indices = @transform_3, window_bounds = array<i64: 8, 8>}]} {
    %c0 = arith.constant 0 : index
    %c0_0 = arith.constant 0 : index
    %0 = vector.load %arg1[%c0, %c0_0] : memref<8x19xf32, #tpu.memory_space<vmem>>, vector<8x16xf32>
    %c0_1 = arith.constant 0 : index
    %c16 = arith.constant 16 : index
    %1 = vector.load %arg1[%c0_1, %c16] : memref<8x19xf32, #tpu.memory_space<vmem>>, vector<8x3xf32>
    %c0_2 = arith.constant 0 : index
    %c0_3 = arith.constant 0 : index
    %2 = vector.load %arg2[%c0_2, %c0_3] : memref<208x128xf32, #tpu.memory_space<vmem>>, vector<16x128xf32>
    %c16_4 = arith.constant 16 : index
    %c0_5 = arith.constant 0 : index
    %3 = vector.load %arg2[%c16_4, %c0_5] : memref<208x128xf32, #tpu.memory_space<vmem>>, vector<128x64xf32>
    %c144 = arith.constant 144 : index
    %c0_6 = arith.constant 0 : index
    %4 = vector.load %arg2[%c144, %c0_6] : memref<208x128xf32, #tpu.memory_space<vmem>>, vector<64x8xf32>
    %c0_7 = arith.constant 0 : index
    %c0_8 = arith.constant 0 : index
    %5 = vector.load %arg3[%c0_7, %c0_8] : memref<8x128xf32, #tpu.memory_space<vmem>>, vector<1x128xf32>
    %c1 = arith.constant 1 : index
    %c0_9 = arith.constant 0 : index
    %6 = vector.load %arg3[%c1, %c0_9] : memref<8x128xf32, #tpu.memory_space<vmem>>, vector<1x64xf32>
    %c2 = arith.constant 2 : index
    %c0_10 = arith.constant 0 : index
    %7 = vector.load %arg3[%c2, %c0_10] : memref<8x128xf32, #tpu.memory_space<vmem>>, vector<1x8xf32>
    %c3 = arith.constant 3 : index
    %c0_11 = arith.constant 0 : index
    %8 = vector.load %arg3[%c3, %c0_11] : memref<8x128xf32, #tpu.memory_space<vmem>>, vector<1x3xf32>
    %cst = arith.constant dense<0.000000e+00> : vector<8x128xf32>
    %9 = tpu.matmul %0, %2, %cst {dimension_numbers = #tpu.dot_dimension_numbers<[1], [0], [0], [1], [0, 0, 1, 1], [], []>} : vector<8x16xf32>, vector<16x128xf32>, vector<8x128xf32> -> vector<8x128xf32>
    %10 = vector.broadcast %5 : vector<1x128xf32> to vector<8x128xf32>
    %11 = arith.addf %9, %10 : vector<8x128xf32>
    %12 = math.tanh %11 : vector<8x128xf32>
    %cst_12 = arith.constant dense<0.000000e+00> : vector<8x64xf32>
    %13 = tpu.matmul %12, %3, %cst_12 {dimension_numbers = #tpu.dot_dimension_numbers<[1], [0], [0], [1], [0, 0, 1, 1], [], []>} : vector<8x128xf32>, vector<128x64xf32>, vector<8x64xf32> -> vector<8x64xf32>
    %14 = vector.broadcast %6 : vector<1x64xf32> to vector<8x64xf32>
    %15 = arith.addf %13, %14 : vector<8x64xf32>
    %16 = math.tanh %15 : vector<8x64xf32>
    %cst_13 = arith.constant dense<0.000000e+00> : vector<8x8xf32>
    %17 = tpu.matmul %16, %4, %cst_13 {dimension_numbers = #tpu.dot_dimension_numbers<[1], [0], [0], [1], [0, 0, 1, 1], [], []>} : vector<8x64xf32>, vector<64x8xf32>, vector<8x8xf32> -> vector<8x8xf32>
    %18 = vector.broadcast %7 : vector<1x8xf32> to vector<8x8xf32>
    %19 = arith.addf %17, %18 : vector<8x8xf32>
    %20 = vector.extract_strided_slice %19 {offsets = [0, 0], sizes = [8, 3], strides = [1, 1]} : vector<8x8xf32> to vector<8x3xf32>
    %cst_14 = arith.constant -2.000000e+00 : f32
    %21 = vector.broadcast %cst_14 : f32 to vector<1x3xf32>
    %22 = arith.mulf %21, %8 : vector<1x3xf32>
    %23 = math.exp %22 : vector<1x3xf32>
    %24 = arith.subf %1, %20 : vector<8x3xf32>
    %25 = arith.mulf %24, %24 : vector<8x3xf32>
    %cst_15 = arith.constant -5.000000e-01 : f32
    %26 = vector.broadcast %cst_15 : f32 to vector<8x3xf32>
    %27 = arith.mulf %26, %25 : vector<8x3xf32>
    %28 = vector.broadcast %23 : vector<1x3xf32> to vector<8x3xf32>
    %29 = arith.mulf %27, %28 : vector<8x3xf32>
    %30 = vector.broadcast %8 : vector<1x3xf32> to vector<8x3xf32>
    %31 = arith.subf %29, %30 : vector<8x3xf32>
    %cst_16 = arith.constant 0.918938517 : f32
    %32 = vector.broadcast %cst_16 : f32 to vector<8x3xf32>
    %33 = arith.subf %31, %32 : vector<8x3xf32>
    %cst_17 = arith.constant dense<0.000000e+00> : vector<8xf32>
    %34 = vector.multi_reduction <add>, %33, %cst_17 [1] : vector<8x3xf32> to vector<8xf32>
    %35 = vector.shape_cast %34 : vector<8xf32> to vector<8x1xf32>
    %36 = tpu.iota {dimensions = array<i32: 1>} : vector<8x8xi32>
    %c4_i32 = arith.constant 4 : i32
    %37 = vector.broadcast %c4_i32 : i32 to vector<8x8xi32>
    %38 = arith.cmpi eq, %36, %37 : vector<8x8xi32>
    %39 = vector.shape_cast %35 : vector<8x1xf32> to vector<8x1xf32>
    %40 = vector.broadcast %39 : vector<8x1xf32> to vector<8x8xf32>
    %41 = arith.select %38, %40, %19 : vector<8x8xi1>, vector<8x8xf32>
    %c0_18 = arith.constant 0 : index
    %c0_19 = arith.constant 0 : index
    %42 = vector.load %arg4[%c0_18, %c0_19] : memref<8x8xf32, #tpu.memory_space<vmem>>, vector<8x8xf32>
    tpu.vector_store %arg4[%c0_18, %c0_19], %41 {strides = array<i32>} : memref<8x8xf32, #tpu.memory_space<vmem>>, vector<8x8xf32>,
    return
  }
  func.func @transform_0(%arg0: i32) -> (i32, i32) {
    %c0_i32 = arith.constant 0 : i32
    %c0_i32_0 = arith.constant 0 : i32
    return %arg0, %c0_i32 : i32, i32
  }
  func.func @transform_1(%arg0: i32) -> (i32, i32) {
    %c0_i32 = arith.constant 0 : i32
    %c0_i32_0 = arith.constant 0 : i32
    %c0_i32_1 = arith.constant 0 : i32
    return %c0_i32, %c0_i32_0 : i32, i32
  }
  func.func @transform_2(%arg0: i32) -> (i32, i32) {
    %c0_i32 = arith.constant 0 : i32
    %c0_i32_0 = arith.constant 0 : i32
    %c0_i32_1 = arith.constant 0 : i32
    return %c0_i32, %c0_i32_0 : i32, i32
  }
  func.func @transform_3(%arg0: i32) -> (i32, i32) {
    %c0_i32 = arith.constant 0 : i32
    %c0_i32_0 = arith.constant 0 : i32
    return %arg0, %c0_i32 : i32, i32
  }
}

</mosaic_0001>

<bundles_post_ra>
// kernel: tpu_custom_call.1
= control target key start
LH: loop header
LB: loop body
LE: loop exit
PB: predicated region body
PF: predicated region fallthrough
CT: control target
= control target key end

     0   :  { %8 = vsyncpa [#allocation3], 0  ;;  %s719_s0 = inlined_call_operand.hbm [shape: f32[8,19], index: 0, kind: input, shape index: {}]   ;;  %s720_s1 = inlined_call_operand.hbm [shape: f32[208,128], index: 1, kind: input, shape index: {}]   ;;  %s721_s2 = inlined_call_operand.hbm [shape: f32[8,128], index: 2, kind: input, shape index: {}]   ;;  %s722_s3 = inlined_call_operand.hbm [shape: f32[8,8], index: 3, kind: output, shape index: {}]  }
   0x1   :  { %9 = vsyncpa [#allocation6], 0 }
   0x2   :  { %10 = vsyncpa [#allocation4], 0  ;;  %s620_s12 = smov [#allocation5]   ;;  %s526_s16 = scalar_lea.hbm %s720_s1, 3328 }
   0x3   :  { %s26_s13 = sshll.u32 %s620_s12, 4  ;;  %p527_p0 = scmp.ne.s32.totalorder %s720_s1, %s526_s16  ;;  %s27_s13 = int_to_ptr.vmem [resolvable:$true] %s26_s13 }
   0x4   :  { %p530_p1 = scmp.lt.u32.totalorder %s526_s16, %s720_s1 }
   0x6   :  { %p532_p2 = pnand %p530_p1, %p527_p0 }
   0x8   :  { %535 = shalt.err (!%p532_p2)
}
   0x9   :  { %s536_s21 = scalar_lea.vmem %s27_s13, 3328  ;;  %p541_p4 = scmp.lt.s32.totalorder %s27_s13, %s27_s13 }
   0xa   :  { %p537_p3 = scmp.ne.s32.totalorder %s27_s13, %s536_s21  ;;  %p542_p5 = scmp.lt.s32.totalorder %s536_s21, %s536_s21 }
   0xc   :  { %p543_p6 = por %p542_p5, %p541_p4 }
   0xe   :  { %p544_p7 = pnand %p543_p6, %p537_p3 }
  0x10   :  { %547 = shalt.err (!%p544_p7)
}
  0x11   :  { %s621_s22 = smov 128   ;;  %s622_s23 = smov 8  }
  0x12   :  { %32 = dma.hbm_to_vmem [thread:$0]  %s720_s1, 3328, %s27_s13, [#allocation6], %s621_s22, %s621_s22, %s622_s23  }
  0x13   :  { %s623_s26 = smov [#allocation2]   ;;  %s624_s28 = smov [#allocation7]  }
  0x14   :  { %s17_s27 = sshll.u32 %s623_s26, 4  ;;  %s39_s29 = sshll.u32 %s624_s28, 4  ;;  %s18_s27 = int_to_ptr.vmem [resolvable:$true] %s17_s27  ;;  %s40_s29 = int_to_ptr.vmem [resolvable:$true] %s39_s29 }
  0x15   :  { %s548_s5 = scalar_lea.hbm %s719_s0, 128 }
  0x16   :  { %p549_p8 = scmp.ne.s32.totalorder %s719_s0, %s548_s5  ;;  %p552_p9 = scmp.lt.u32.totalorder %s548_s5, %s719_s0 }
  0x18   :  { %p554_p10 = pnand %p552_p9, %p549_p8 }
  0x1a   :  { %557 = shalt.err (!%p554_p10)
}
  0x1b   :  { %s558_s1 = scalar_lea.vmem %s18_s27, 128  ;;  %p563_p12 = scmp.lt.s32.totalorder %s18_s27, %s18_s27 }
  0x1c   :  { %p559_p11 = scmp.ne.s32.totalorder %s18_s27, %s558_s1  ;;  %p564_p13 = scmp.lt.s32.totalorder %s558_s1, %s558_s1 }
  0x1e   :  { %p565_p0 = por %p564_p13, %p563_p12 }
  0x20   :  { %p566_p1 = pnand %p565_p0, %p559_p11 }
  0x22   :  { %569 = shalt.err (!%p566_p1)
}
  0x23   :  { %20 = dma.hbm_to_vmem [thread:$0]  %s719_s0, 128, %s18_s27, [#allocation3]  }
  0x24   :  { %s570_s14 = scalar_lea.hbm %s721_s2, 128 }
  0x25   :  { %p571_p2 = scmp.ne.s32.totalorder %s721_s2, %s570_s14  ;;  %p574_p3 = scmp.lt.u32.totalorder %s570_s14, %s721_s2 }
  0x27   :  { %p576_p4 = pnand %p574_p3, %p571_p2 }
  0x29   :  { %579 = shalt.err (!%p576_p4)
}
  0x2a   :  { %s580_s19 = scalar_lea.vmem %s40_s29, 128  ;;  %p585_p6 = scmp.lt.s32.totalorder %s40_s29, %s40_s29 }
  0x2b   :  { %p581_p5 = scmp.ne.s32.totalorder %s40_s29, %s580_s19  ;;  %p586_p7 = scmp.lt.s32.totalorder %s580_s19, %s580_s19 }
  0x2d   :  { %p587_p8 = por %p586_p7, %p585_p6 }
  0x2f   :  { %p588_p9 = pnand %p587_p8, %p581_p5 }
  0x31   :  { %591 = shalt.err (!%p588_p9)
}
  0x32   :  { %42 = dma.hbm_to_vmem [thread:$0]  %s721_s2, 128, %s40_s29, [#allocation6]  }
  0x33   :  { %614 = dma.done.wait [#allocation3], 128  }
  0x34   :  { %615 = vsyncadd [#allocation3], 4294967168 }
  0x35   :  { %616 = dma.done.wait [#allocation6], 3456  }
  0x36   :  { %617 = vsyncadd [#allocation6], 4294963840  ;;  %v625_v0 = vmov 0.0|0.0   ;;  %vm626_vm0 = vmmov 0   ;;  %v627_v1 = vmov 0.0   ;;  %v53_v2 = vld [vmem:[#allocation5] sm:$0xff]  ;;  %v325_v55 = vlaneseq }
  0x37   :  { %470 = vmatprep.subr.bf16.mxu0 %v625_v0  ;;  %413 = vmatprep.mubr.msk.f32.mxu0 %vm626_vm0, %v627_v1  ;;  %v54_v3 = vld [vmem:[#allocation5 + $0x8] sm:$0xff]  ;;  %v55_v5 = vld [vmem:[#allocation5 + $0x10] sm:$0xff]  ;;  %v56_v6 = vld [vmem:[#allocation5 + $0x18] sm:$0xff]  ;;  %vm87_vm1 = vcmask 130048   ;;  %vm241_vm2 = vcmask 523264   ;;  %s628_s2 = smov 16  }
  0x38   :  { %473 = vmatprep.subr.bf16.mxu1 %v625_v0  ;;  %448 = vmatprep.mubr.msk.f32.mxu1 %vm626_vm0, %v627_v1  ;;  %v471_v4 = vpack.c.bf16 %v54_v3, %v53_v2  ;;  %v57_v7 = vld [vmem:[#allocation5 + $0x20] sm:$0xff]  ;;  %v474_v8 = vpack.c.bf16 %v56_v6, %v55_v5  ;;  %v58_v9 = vld [vmem:[#allocation5 + $0x28] sm:$0xff]  ;;  %v691_v10 = vld [vmem:[#allocation2] sm:$0xff]  ;;  %v326_v56 = vshrl.u32 %v325_v55, 7  ;;  %s629_s21 = smov 112   ;;  %vm348_vm3 = vcmask 23552  }
  0x39   :  { %v477_v11 = vpack.c.bf16 %v58_v9, %v57_v7  ;;  %v59_v12 = vld [vmem:[#allocation5 + $0x30] sm:$0xff]  ;;  %v60_v13 = vld [vmem:[#allocation5 + $0x38] sm:$0xff]  ;;  %v61_v15 = vld [vmem:[#allocation5 + $0x40] sm:$0xff]  ;;  %s630_s22 = smov [#allocation8]   ;;  %vm356_vm5 = vcmask 64512  }
  0x3a   :  { %472 = vmatpush3.bf16.msra.mxu0 %v471_v4  ;;  %475 = vmatpush3.bf16.msra.mxu1 %v474_v8  ;;  %v480_v14 = vpack.c.bf16 %v60_v13, %v59_v12  ;;  %v62_v16 = vld [vmem:[#allocation5 + $0x48] sm:$0xff]  ;;  %v63_v18 = vld [vmem:[#allocation5 + $0x50] sm:$0xff]  ;;  %v64_v19 = vld [vmem:[#allocation5 + $0x58] sm:$0xff]  ;;  %v327_v57 = vsub.s32 0, %v326_v56  ;;  %v353_v13 = vand.u32 127, %v325_v55  ;;  %s364_s23 = sshll.u32 %s630_s22, 4  ;;  %s365_s23 = int_to_ptr.vmem [resolvable:$true] %s364_s23 }
  0x3b   :  { %497 = vmatprep.subr.bf16.mxu0 %v625_v0  ;;  %476 = vmatprep.subr.bf16.mxu1 %v625_v0  ;;  %v483_v17 = vpack.c.bf16 %v62_v16, %v61_v15  ;;  %v486_v20 = vpack.c.bf16 %v64_v19, %v63_v18  ;;  %v65_v21 = vld [vmem:[#allocation5 + $0x60] sm:$0xff]  ;;  %v66_v22 = vld [vmem:[#allocation5 + $0x68] sm:$0xff]  ;;  %v67_v24 = vld [vmem:[#allocation5 + $0x70] sm:$0xff]  ;;  %s592_s24 = scalar_lea.vmem %s365_s23, 128  ;;  %p597_p11 = scmp.lt.s32.totalorder %s365_s23, %s365_s23 }
  0x3c   :  { %v489_v23 = vpack.c.bf16 %v66_v22, %v65_v21  ;;  %v68_v25 = vld [vmem:[#allocation5 + $0x78] sm:$0xff]  ;;  %v69_v27 = vld [vmem:[#allocation5 + $0x80] sm:$0xff]  ;;  %v70_v28 = vld [vmem:[#allocation5 + $0x88] sm:$0xff]  ;;  %vm354_vm4 = vcmp.eq.s32.totalorder %v353_v13, 4  ;;  %p593_p10 = scmp.ne.s32.totalorder %s365_s23, %s592_s24  ;;  %p598_p12 = scmp.lt.s32.totalorder %s592_s24, %s592_s24 }
  0x3d   :  { %414 = vmatmul.mubr.msk.f32.vlgmr.msra.gmra.mrb[0].mxu0 %vm87_vm1, %v691_v10  ;;  %v492_v26 = vpack.c.bf16 %v68_v25, %v67_v24  ;;  %v495_v29 = vpack.c.bf16 %v70_v28, %v69_v27  ;;  %v71_v30 = vld [vmem:[#allocation5 + $0x90] sm:$0xff]  ;;  %v72_v31 = vld [vmem:[#allocation5 + $0x98] sm:$0xff]  ;;  %v73_v38 = vld [vmem:[#allocation5 + $0xa0] sm:$0xff] }
  0x3e   :  { %467 = vmatprep.mubr.msk.f32.mxu0 %vm626_vm0, %v627_v1  ;;  %478 = vmatpush3.bf16.msra.mxu1 %v477_v11  ;;  %v498_v32 = vpack.c.bf16 %v72_v31, %v71_v30  ;;  %v374_v33 = vld [vmem:[#allocation7] ss:$0 sm:$0xff]  ;;  %v74_v39 = vld [vmem:[#allocation5 + $0xa8] sm:$0xff]  ;;  %v76_v42 = vld [vmem:[#allocation5 + $0xb8] sm:$0xff]  ;;  %p599_p13 = por %p598_p12, %p597_p11 }
  0x3f   :  { %479 = vmatprep.subr.bf16.mxu1 %v625_v0  ;;  %v501_v40 = vpack.c.bf16 %v74_v39, %v73_v38  ;;  %v75_v41 = vld [vmem:[#allocation5 + $0xb0] sm:$0xff]  ;;  %v77_v44 = vld [vmem:[#allocation5 + $0xc0] sm:$0xff]  ;;  %v78_v45 = vld [vmem:[#allocation5 + $0xc8] sm:$0xff] }
  0x40   :  { %499 = vmatpush3.bf16.msra.mxu0 %v498_v32  ;;  %v504_v43 = vpack.c.bf16 %v76_v42, %v75_v41  ;;  %v507_v46 = vpack.c.bf16 %v78_v45, %v77_v44  ;;  %v376_v47 = vld [vmem:[#allocation7 + $0x1] ss:$0 sm:$0xff]  ;;  %v82_v52 = vld [vmem:[#allocation7 + $0x3] sm:$0x1]  ;;  %v377_v61 = vld [vmem:[#allocation7 + $0x2] ss:$0 sm:$0xff]  ;;  %p600_p0 = pnand %p599_p13, %p593_p10 }
  0x41   :  { %500 = vmatprep.subr.bf16.mxu0 %v625_v0  ;;  %v315_v53 = vmul.f32 -2.0, %v82_v52  ;;  %v337_v60 = vrot.slane %v82_v52, %v327_v57 }
  0x42   :  { %481 = vmatpush3.bf16.msra.mxu1 %v480_v14 }
  0x43   :  { %482 = vmatprep.subr.bf16.mxu1 %v625_v0  ;;  %v316_v54 = vmul.f32 1.442695, %v315_v53  ;;  %339 = vrot.lane.b32.xlu1 %v337_v60, %s628_s2 }
  0x44   :  { %502 = vmatpush3.bf16.msra.mxu0 %v501_v40 }
  0x45   :  { %503 = vmatprep.subr.bf16.mxu0 %v625_v0 }
  0x46   :  { %484 = vmatpush3.bf16.msra.mxu1 %v483_v17 }
  0x47   :  { %485 = vmatprep.subr.bf16.mxu1 %v625_v0 }
  0x48   :  { %505 = vmatpush3.bf16.msra.mxu0 %v504_v43 }
  0x49   :  { %506 = vmatprep.subr.bf16.mxu0 %v625_v0 }
  0x4a   :  { %487 = vmatpush3.bf16.msra.mxu1 %v486_v20 }
  0x4b   :  { %488 = vmatprep.subr.bf16.mxu1 %v625_v0 }
  0x4c   :  { %508 = vmatpush3.bf16.msra.mxu0 %v507_v46 }
  0x4e   :  { %490 = vmatpush3.bf16.msra.mxu1 %v489_v23 }
  0x4f   :  { %491 = vmatprep.subr.bf16.mxu1 %v625_v0 }
  0x52   :  { %493 = vmatpush3.bf16.msra.mxu1 %v492_v26 }
  0x53   :  { %494 = vmatprep.subr.bf16.mxu1 %v625_v0 }
  0x56   :  { %496 = vmatpush3.bf16.msra.mxu1 %v495_v29 }
  0xb5   :  { %v340_v6 = vpop.permute.xlu1 %339 }
 0x110   :  { %v157_v34 = vpop.f32.mrb[0].mxu0 }
 0x111   :  { %v158_v35 = vadd.f32 %v374_v33, %v157_v34  ;;  %v415_v36 = vpop.f32.mrb[1].mxu0 }
 0x113   :  { %520 = vtanh.f32 %v158_v35 }
 0x11d   :  { %v521_v37 = vpop.eup %520 }
 0x11e   :  { %449 = vmatmul.mubr.f32.vlgmr.msra.gmra.mrb[0].mxu1 %v521_v37 }
 0x1f1   :  { %v232_v48 = vpop.f32.mrb[0].mxu1 }
 0x1f2   :  { %v233_v49 = vadd.f32 %v376_v47, %v232_v48  ;;  %v450_v50 = vpop.f32.mrb[1].mxu1 }
 0x1f4   :  { %522 = vtanh.f32 %v233_v49 }
 0x1f5   :  { %524 = vpow2.f32 %v316_v54 }
 0x1fe   :  { %v523_v51 = vpop.eup %522 }
 0x1ff   :  { %468 = vmatmul.mubr.msk.f32.vlgmr.msra.gmra.mrb[2].mxu0 %vm241_vm2, %v523_v51  ;;  %v525_v58 = vpop.eup %524 }
 0x200   :  { %v328_v59 = vrot.slane %v525_v58, %v327_v57 }
 0x2d2   :  { %v311_v62 = vpop.f32.mrb[2].mxu0 }
 0x2d3   :  { %v312_v63 = vadd.f32 %v377_v61, %v311_v62  ;;  %v469_v0 = vpop.f32.mrb[3].mxu0 }
 0x2d5   :  { %319 = vrot.lane.b32.xlu0 %v312_v63, %s628_s2 }
 0x2d9   :  { %330 = vrot.lane.b32.xlu0 %v328_v59, %s628_s2 }
 0x347   :  { %v320_v1 = vpop.permute.xlu0 %319 }
 0x348   :  { %v322_v2 = vsub.f32 %v691_v10, %v320_v1 }
 0x34a   :  { %v323_v3 = vmul.f32 %v322_v2, %v322_v2 }
 0x34b   :  { %v331_v4 = vpop.permute.xlu0 %330 }
 0x34c   :  { %v324_v5 = vmul.f32 -0.5, %v323_v3 }
 0x34e   :  { %v333_v7 = vmul.f32 %v331_v4, %v324_v5 }
 0x350   :  { %v342_v8 = vsub.f32 %v333_v7, %v340_v6 }
 0x352   :  { %v379_v9 = vadd.f32 -0.9189385, %v342_v8 }
 0x354   :  { %345 = vrot.lane.b32.xlu1 %v379_v9, %s629_s21 }
 0x3c6   :  { %v346_v11 = vpop.permute.xlu1 %345 }
 0x3c7   :  { %v349_v12 = vsel %vm348_vm3, %v346_v11, 0.0 }
 0x3c8   :  { %350 = vadd.xlane.f32.xlu0 %v349_v12 }
 0x455   :  { %v351_v14 = vpop.xlane.xlu0 %350 }
 0x456   :  { %v355_v10 = vsel %vm354_vm4, %v351_v14, %v312_v63 }
 0x457   :  { %357 = vst.msk [vmem:[#allocation8] sm:$0xff] %vm356_vm5, %v355_v10 }
 0x458   :  { %603 = shalt.err (!%p600_p0)
}
 0x459   :  { %s604_s27 = scalar_lea.hbm %s722_s3, 128 }
 0x45a   :  { %p605_p1 = scmp.ne.s32.totalorder %s722_s3, %s604_s27  ;;  %p608_p2 = scmp.lt.u32.totalorder %s604_s27, %s722_s3 }
 0x45c   :  { %p610_p3 = pnand %p608_p2, %p605_p1 }
 0x45e   :  { %613 = shalt.err (!%p610_p3)
}
 0x45f   :  { %367 = dma.vmem_to_hbm [thread:$0]  %s365_s23, 128, %s722_s3, [#allocation4]  }
 0x460   :  { %618 = dma.done.wait [#allocation4], 128  }
 0x461   :  { %619 = vsyncadd [#allocation4], 4294967168 }
 0x462   :  { %371 = vsyncpa [#allocation3], 1 }
 0x463   :  { %372 = vsyncpa [#allocation6], 1 }
 0x464   :  { %373 = vsyncpa [#allocation4], 1 }

</bundles_post_ra>
